<compile_context>
chip_gen: v5e
topology: v5e:2x2
jax: 0.10.0
libtpu: 0.0.40
codegen_flags: <defaults>
</compile_context>

<pallas_src>
import functools

import jax
import jax.numpy as jnp
from jax.experimental import pallas as pl
from jax.experimental.pallas import tpu as pltpu


# ----------------------------------------------------------------------------
# In-kernel helpers (operate on VMEM-resident values)
# ----------------------------------------------------------------------------
def _bf16(x):
    return x.astype(jnp.bfloat16)


def _layernorm(x, g, b, eps):
    mean = jnp.mean(x, axis=-1, keepdims=True)
    var = jnp.mean(jnp.square(x - mean), axis=-1, keepdims=True)
    return (x - mean) * jax.lax.rsqrt(var + eps) * g + b


def _gelu_tanh(x):
    # TODO(synk): PyTorch nn.GELU default is exact erf-GELU; tanh approx used
    # for robust Mosaic lowering (runs on the EUP).
    return 0.5 * x * (1.0 + jnp.tanh(
        0.7978845608028654 * (x + 0.044715 * x * x * x)))


# ----------------------------------------------------------------------------
# Kernels
# ----------------------------------------------------------------------------
def _embed_kernel(p_ref, w_ref, b_ref, cls_ref, pos_ref, o_ref):
    """Patch-embed matmul fused with CLS concat + positional-embedding add.

    One grid step == one batch sample. p_ref: (1, N, C*P*P), output (1, S, D).
    """
    patches = p_ref[0]                                   # (N, C*P*P) f32
    N = patches.shape[0]
    tok = jnp.dot(_bf16(patches), w_ref[...],
                  preferred_element_type=jnp.float32) + b_ref[...]   # (N, D)
    # Row 0: CLS token; rows 1..N: patch tokens.  Both get pos_embed added.
    o_ref[0, 0:1, :] = cls_ref[...] + pos_ref[0, 0:1, :]
    o_ref[0, 1:N + 1, :] = tok + pos_ref[0, 1:N + 1, :]


def _block_kernel(x_ref,
                  ln1g_ref, ln1b_ref, qkvw_ref, qkvb_ref,
                  projw_ref, projb_ref, ls1_ref,
                  ln2g_ref, ln2b_ref, fc1w_ref, fc1b_ref,
                  fc2w_ref, fc2b_ref, ls2_ref,
                  o_ref, *, heads, eps):
    """One full DINOv2 transformer block for one batch sample, fully in VMEM."""
    x = x_ref[0]                                         # (S, D) residual, f32
    S, D = x.shape
    Dh = D // heads
    scale = float(Dh) ** -0.5

    # ---- attention branch ---------------------------------------------------
    h = _layernorm(x, ln1g_ref[...], ln1b_ref[...], eps)
    qkv = jnp.dot(_bf16(h), qkvw_ref[...],
                  preferred_element_type=jnp.float32) + qkvb_ref[...]  # (S, 3D)

    # All heads handled in this single grid step (static unroll).  Head merge
    # is folded into the proj matmul: accumulate per-head (S,Dh) @ proj_w rows.
    proj = jnp.zeros((S, D), jnp.float32)
    for hd in range(heads):
        q = qkv[:, hd * Dh:(hd + 1) * Dh] * scale
        k = qkv[:, D + hd * Dh:D + (hd + 1) * Dh]
        v = qkv[:, 2 * D + hd * Dh:2 * D + (hd + 1) * Dh]
        # q @ k^T via dot_general contracting the Dh axes (no transpose op).
        s = jax.lax.dot_general(
            _bf16(q), _bf16(k),
            dimension_numbers=(((1,), (1,)), ((), ())),
            preferred_element_type=jnp.float32)                        # (S, S)
        s = s - jnp.max(s, axis=-1, keepdims=True)
        p = jnp.exp(s)
        p = p * pl.reciprocal(jnp.sum(p, axis=-1, keepdims=True), approx=True)
        oh = jnp.dot(_bf16(p), _bf16(v),
                     preferred_element_type=jnp.float32)               # (S, Dh)
        proj = proj + jnp.dot(_bf16(oh),
                              projw_ref[hd * Dh:(hd + 1) * Dh, :],
                              preferred_element_type=jnp.float32)
    x = x + (proj + projb_ref[...]) * ls1_ref[...]       # LayerScale + residual

    # ---- MLP branch ---------------------------------------------------------
    h2 = _layernorm(x, ln2g_ref[...], ln2b_ref[...], eps)
    m = jnp.dot(_bf16(h2), fc1w_ref[...],
                preferred_element_type=jnp.float32) + fc1b_ref[...]
    m = _gelu_tanh(m)
    m = jnp.dot(_bf16(m), fc2w_ref[...],
                preferred_element_type=jnp.float32) + fc2b_ref[...]
    o_ref[0] = x + m * ls2_ref[...]


def _head_kernel(x_ref, g_ref, b_ref, fcw_ref, fcb_ref, feat_ref, out_ref,
                 *, eps):
    """Final LayerNorm on the CLS tokens (LN is per-token, so this equals
    LN(full seq)[:, 0]) fused with the trainable `fc` head."""
    cls = jnp.squeeze(x_ref[:, 0:1, :], axis=1)          # (B, D)
    f = _layernorm(cls, g_ref[...], b_ref[...], eps)
    feat_ref[...] = f
    out_ref[...] = jnp.dot(_bf16(f), fcw_ref[...],
                           preferred_element_type=jnp.float32) + fcb_ref[...]


# ----------------------------------------------------------------------------
# Parameter init (deterministic, synthetic — no checkpoint load).
# Matmul weights stored in bf16; everything else f32.
# ----------------------------------------------------------------------------
def init_params(key, cfg):
    C, P, D = cfg["in_chans"], cfg["patch"], cfg["dim"]
    depth = cfg["depth"]
    hidden, num_classes = cfg["mlp_hidden"], cfg["num_classes"]
    S = cfg["n_patches"] + 1

    def nrm(k, shape, scale=0.02):
        return scale * jax.random.normal(k, shape, dtype=jnp.float32)

    def nrm_bf16(k, shape, scale=0.02):
        return nrm(k, shape, scale).astype(jnp.bfloat16)

    keys = iter(jax.random.split(key, 16 + 8 * depth))
    params = {
        "patch_w": nrm_bf16(next(keys), (C * P * P, D)),   # flat (C,kh,kw) -> D
        "patch_b": jnp.zeros((1, D), jnp.float32),
        "cls_token": nrm(next(keys), (1, D)),
        "pos_embed": nrm(next(keys), (1, S, D)),
        "norm_g": jnp.ones((1, D), jnp.float32),
        "norm_b": jnp.zeros((1, D), jnp.float32),
        "fc_w": nrm_bf16(next(keys), (D, num_classes)),
        "fc_b": jnp.zeros((1, num_classes), jnp.float32),
        "blocks": [],
    }
    for _ in range(depth):
        params["blocks"].append({
            "ln1_g": jnp.ones((1, D), jnp.float32),
            "ln1_b": jnp.zeros((1, D), jnp.float32),
            "qkv_w": nrm_bf16(next(keys), (D, 3 * D)),
            "qkv_b": jnp.zeros((1, 3 * D), jnp.float32),
            "proj_w": nrm_bf16(next(keys), (D, D)),
            "proj_b": jnp.zeros((1, D), jnp.float32),
            "ls1": jnp.full((1, D), 1e-5, jnp.float32),    # DINOv2 LayerScale
            "ln2_g": jnp.ones((1, D), jnp.float32),
            "ln2_b": jnp.zeros((1, D), jnp.float32),
            "fc1_w": nrm_bf16(next(keys), (D, hidden)),
            "fc1_b": jnp.zeros((1, hidden), jnp.float32),
            "fc2_w": nrm_bf16(next(keys), (hidden, D)),
            "fc2_b": jnp.zeros((1, D), jnp.float32),
            "ls2": jnp.full((1, D), 1e-5, jnp.float32),
        })
    return params


# ----------------------------------------------------------------------------
# Forward pass (mirrors DINOv2ModelTune.forward: backbone features -> fc head)
# ----------------------------------------------------------------------------
def dinov2_forward(params, x, cfg, return_feature=False):
    B, C, H, W = x.shape
    P, D, heads = cfg["patch"], cfg["dim"], cfg["heads"]
    hidden, num_classes = cfg["mlp_hidden"], cfg["num_classes"]
    n_h, n_w = H // P, W // P
    N = n_h * n_w
    S = N + 1
    CPP = C * P * P
    eps = 1e-6

    # --- patchify (pure layout glue, stays in XLA), then fused embed kernel ---
    patches = x.reshape(B, C, n_h, P, n_w, P).transpose(0, 2, 4, 1, 3, 5)
    patches = patches.reshape(B, N, CPP)

    x_tok = pl.pallas_call(
        _embed_kernel,
        out_shape=jax.ShapeDtypeStruct((B, S, D), jnp.float32),
        grid=(B,),
        in_specs=[
            pl.BlockSpec((1, N, CPP), lambda i: (i, 0, 0)),
            pl.BlockSpec((CPP, D), lambda i: (0, 0)),
            pl.BlockSpec((1, D), lambda i: (0, 0)),
            pl.BlockSpec((1, D), lambda i: (0, 0)),
            pl.BlockSpec((1, S, D), lambda i: (0, 0, 0)),
        ],
        out_specs=pl.BlockSpec((1, S, D), lambda i: (i, 0, 0)),
        compiler_params=pltpu.CompilerParams(
            dimension_semantics=("parallel",)),
    )(patches, params["patch_w"], params["patch_b"],
      params["cls_token"], params["pos_embed"])

    # --- transformer blocks: ONE fused pallas_call per block ------------------
    vec = lambda d: pl.BlockSpec((1, d), lambda i: (0, 0))
    mat = lambda k, n: pl.BlockSpec((k, n), lambda i: (0, 0))
    act = pl.BlockSpec((1, S, D), lambda i: (i, 0, 0))
    block_call = pl.pallas_call(
        functools.partial(_block_kernel, heads=heads, eps=eps),
        out_shape=jax.ShapeDtypeStruct((B, S, D), jnp.float32),
        grid=(B,),
        in_specs=[
            act,
            vec(D), vec(D),                 # ln1 gamma / beta
            mat(D, 3 * D), vec(3 * D),      # qkv
            mat(D, D), vec(D),              # proj
            vec(D),                         # layerscale 1
            vec(D), vec(D),                 # ln2 gamma / beta
            mat(D, hidden), vec(hidden),    # fc1
            mat(hidden, D), vec(D),         # fc2
            vec(D),                         # layerscale 2
        ],
        out_specs=act,
        compiler_params=pltpu.CompilerParams(
            dimension_semantics=("parallel",)),
    )
    for blk in params["blocks"]:
        x_tok = block_call(
            x_tok,
            blk["ln1_g"], blk["ln1_b"], blk["qkv_w"], blk["qkv_b"],
            blk["proj_w"], blk["proj_b"], blk["ls1"],
            blk["ln2_g"], blk["ln2_b"], blk["fc1_w"], blk["fc1_b"],
            blk["fc2_w"], blk["fc2_b"], blk["ls2"])

    # --- final LN (CLS token) + fc head, fused ---------------------------------
    feats, logits = pl.pallas_call(
        functools.partial(_head_kernel, eps=eps),
        out_shape=(jax.ShapeDtypeStruct((B, D), jnp.float32),
                   jax.ShapeDtypeStruct((B, num_classes), jnp.float32)),
        grid=(1,),
        in_specs=[
            pl.BlockSpec((B, S, D), lambda i: (0, 0, 0)),
            pl.BlockSpec((1, D), lambda i: (0, 0)),
            pl.BlockSpec((1, D), lambda i: (0, 0)),
            pl.BlockSpec((D, num_classes), lambda i: (0, 0)),
            pl.BlockSpec((1, num_classes), lambda i: (0, 0)),
        ],
        out_specs=(pl.BlockSpec((B, D), lambda i: (0, 0)),
                   pl.BlockSpec((B, num_classes), lambda i: (0, 0))),
    )(x_tok, params["norm_g"], params["norm_b"],
      params["fc_w"], params["fc_b"])

    return feats if return_feature else logits


if __name__ == "__main__":
    cfg = dict(
        in_chans=3, patch=8, dim=32, heads=2, depth=2,
        mlp_hidden=128, num_classes=1,
    )
    B, H, W = 2, 16, 16
    cfg["n_patches"] = (H // cfg["patch"]) * (W // cfg["patch"])

    key = jax.random.PRNGKey(0)
    k_params, k_x = jax.random.split(key)
    params = init_params(k_params, cfg)
    x = jax.random.normal(k_x, (B, cfg["in_chans"], H, W), dtype=jnp.float32)

    fwd = jax.jit(functools.partial(dinov2_forward, cfg=cfg))
    out = jax.block_until_ready(fwd(params, x))
    assert out.shape == (B, cfg["num_classes"]), out.shape

    fwd_feat = jax.jit(functools.partial(dinov2_forward, cfg=cfg,
                                         return_feature=True))
    feats = jax.block_until_ready(fwd_feat(params, x))
    assert feats.shape == (B, cfg["dim"]), feats.shape

    print("KERNEL_OK")
</pallas_src>

<mosaic_0001>
module attributes {stable_mosaic.version = 11 : i64} {
  func.func @_embed_kernel(%arg0: i32, %arg1: memref<1x4x192xf32, #tpu.memory_space<vmem>>, %arg2: memref<192x32xbf16, #tpu.memory_space<vmem>>, %arg3: memref<1x32xf32, #tpu.memory_space<vmem>>, %arg4: memref<1x32xf32, #tpu.memory_space<vmem>>, %arg5: memref<1x5x32xf32, #tpu.memory_space<vmem>>, %arg6: memref<1x5x32xf32, #tpu.memory_space<vmem>>) attributes {dimension_semantics = [#tpu.dimension_semantics<parallel>], iteration_bounds = array<i64: 2>, scalar_prefetch = 0 : i64, scratch_operands = 0 : i64, tpu.core_type = #tpu.core_type<tc>, window_params = [{transform_indices = @transform_0, window_bounds = array<i64: 1, 4, 192>}, {pipeline_mode = #tpu.pipeline_mode<synchronous>, transform_indices = @transform_1, window_bounds = array<i64: 192, 32>}, {pipeline_mode = #tpu.pipeline_mode<synchronous>, transform_indices = @transform_2, window_bounds = array<i64: 1, 32>}, {pipeline_mode = #tpu.pipeline_mode<synchronous>, transform_indices = @transform_3, window_bounds = array<i64: 1, 32>}, {pipeline_mode = #tpu.pipeline_mode<synchronous>, transform_indices = @transform_4, window_bounds = array<i64: 1, 5, 32>}, {transform_indices = @transform_5, window_bounds = array<i64: 1, 5, 32>}]} {
    %c0 = arith.constant 0 : index
    %c0_0 = arith.constant 0 : index
    %c0_1 = arith.constant 0 : index
    %0 = vector.load %arg1[%c0, %c0_0, %c0_1] : memref<1x4x192xf32, #tpu.memory_space<vmem>>, vector<1x4x192xf32>
    %1 = vector.shape_cast %0 : vector<1x4x192xf32> to vector<4x192xf32>
    %2 = arith.truncf %1 : vector<4x192xf32> to vector<4x192xbf16>
    %c0_2 = arith.constant 0 : index
    %c0_3 = arith.constant 0 : index
    %3 = vector.load %arg2[%c0_2, %c0_3] : memref<192x32xbf16, #tpu.memory_space<vmem>>, vector<192x32xbf16>
    %cst = arith.constant dense<0.000000e+00> : vector<4x32xf32>
    %4 = tpu.matmul %2, %3, %cst {dimension_numbers = #tpu.dot_dimension_numbers<[1], [0], [0], [1], [0, 0, 1, 1], [], []>} : vector<4x192xbf16>, vector<192x32xbf16>, vector<4x32xf32> -> vector<4x32xf32>
    %c0_4 = arith.constant 0 : index
    %c0_5 = arith.constant 0 : index
    %5 = vector.load %arg3[%c0_4, %c0_5] : memref<1x32xf32, #tpu.memory_space<vmem>>, vector<1x32xf32>
    %6 = vector.broadcast %5 : vector<1x32xf32> to vector<4x32xf32>
    %7 = arith.addf %4, %6 : vector<4x32xf32>
    %c0_6 = arith.constant 0 : index
    %c0_7 = arith.constant 0 : index
    %8 = vector.load %arg4[%c0_6, %c0_7] : memref<1x32xf32, #tpu.memory_space<vmem>>, vector<1x32xf32>
    %c0_8 = arith.constant 0 : index
    %c0_9 = arith.constant 0 : index
    %c0_10 = arith.constant 0 : index
    %9 = vector.load %arg5[%c0_8, %c0_9, %c0_10] : memref<1x5x32xf32, #tpu.memory_space<vmem>>, vector<1x1x32xf32>
    %10 = vector.shape_cast %9 : vector<1x1x32xf32> to vector<1x32xf32>
    %11 = arith.addf %8, %10 : vector<1x32xf32>
    %c0_11 = arith.constant 0 : index
    %c0_12 = arith.constant 0 : index
    %c0_13 = arith.constant 0 : index
    %12 = vector.load %arg6[%c0_11, %c0_12, %c0_13] : memref<1x5x32xf32, #tpu.memory_space<vmem>>, vector<1x1x32xf32>
    %13 = vector.shape_cast %12 : vector<1x1x32xf32> to vector<1x32xf32>
    %14 = vector.shape_cast %11 : vector<1x32xf32> to vector<1x1x32xf32>
    tpu.vector_store %arg6[%c0_11, %c0_12, %c0_13], %14 {strides = array<i32>} : memref<1x5x32xf32, #tpu.memory_space<vmem>>, vector<1x1x32xf32>,
    %c0_14 = arith.constant 0 : index
    %c1 = arith.constant 1 : index
    %c0_15 = arith.constant 0 : index
    %15 = vector.load %arg5[%c0_14, %c1, %c0_15] : memref<1x5x32xf32, #tpu.memory_space<vmem>>, vector<1x4x32xf32>
    %16 = vector.shape_cast %15 : vector<1x4x32xf32> to vector<4x32xf32>
    %17 = arith.addf %7, %16 : vector<4x32xf32>
    %c0_16 = arith.constant 0 : index
    %c1_17 = arith.constant 1 : index
    %c0_18 = arith.constant 0 : index
    %18 = vector.load %arg6[%c0_16, %c1_17, %c0_18] : memref<1x5x32xf32, #tpu.memory_space<vmem>>, vector<1x4x32xf32>
    %19 = vector.shape_cast %18 : vector<1x4x32xf32> to vector<4x32xf32>
    %20 = vector.shape_cast %17 : vector<4x32xf32> to vector<1x4x32xf32>
    tpu.vector_store %arg6[%c0_16, %c1_17, %c0_18], %20 {strides = array<i32>} : memref<1x5x32xf32, #tpu.memory_space<vmem>>, vector<1x4x32xf32>,
    return
  }
  func.func @transform_0(%arg0: i32) -> (i32, i32, i32) {
    %c0_i32 = arith.constant 0 : i32
    %c0_i32_0 = arith.constant 0 : i32
    %c0_i32_1 = arith.constant 0 : i32
    return %arg0, %c0_i32, %c0_i32_0 : i32, i32, i32
  }
  func.func @transform_1(%arg0: i32) -> (i32, i32) {
    %c0_i32 = arith.constant 0 : i32
    %c0_i32_0 = arith.constant 0 : i32
    %c0_i32_1 = arith.constant 0 : i32
    return %c0_i32, %c0_i32_0 : i32, i32
  }
  func.func @transform_2(%arg0: i32) -> (i32, i32) {
    %c0_i32 = arith.constant 0 : i32
    %c0_i32_0 = arith.constant 0 : i32
    %c0_i32_1 = arith.constant 0 : i32
    return %c0_i32, %c0_i32_0 : i32, i32
  }
  func.func @transform_3(%arg0: i32) -> (i32, i32) {
    %c0_i32 = arith.constant 0 : i32
    %c0_i32_0 = arith.constant 0 : i32
    %c0_i32_1 = arith.constant 0 : i32
    return %c0_i32, %c0_i32_0 : i32, i32
  }
  func.func @transform_4(%arg0: i32) -> (i32, i32, i32) {
    %c0_i32 = arith.constant 0 : i32
    %c0_i32_0 = arith.constant 0 : i32
    %c0_i32_1 = arith.constant 0 : i32
    %c0_i32_2 = arith.constant 0 : i32
    return %c0_i32, %c0_i32_0, %c0_i32_1 : i32, i32, i32
  }
  func.func @transform_5(%arg0: i32) -> (i32, i32, i32) {
    %c0_i32 = arith.constant 0 : i32
    %c0_i32_0 = arith.constant 0 : i32
    %c0_i32_1 = arith.constant 0 : i32
    return %arg0, %c0_i32, %c0_i32_0 : i32, i32, i32
  }
}

module attributes {stable_mosaic.version = 11 : i64} {
  func.func @_block_kernel(%arg0: i32, %arg1: memref<1x5x32xf32, #tpu.memory_space<vmem>>, %arg2: memref<1x32xf32, #tpu.memory_space<vmem>>, %arg3: memref<1x32xf32, #tpu.memory_space<vmem>>, %arg4: memref<32x96xbf16, #tpu.memory_space<vmem>>, %arg5: memref<1x96xf32, #tpu.memory_space<vmem>>, %arg6: memref<32x32xbf16, #tpu.memory_space<vmem>>, %arg7: memref<1x32xf32, #tpu.memory_space<vmem>>, %arg8: memref<1x32xf32, #tpu.memory_space<vmem>>, %arg9: memref<1x32xf32, #tpu.memory_space<vmem>>, %arg10: memref<1x32xf32, #tpu.memory_space<vmem>>, %arg11: memref<32x128xbf16, #tpu.memory_space<vmem>>, %arg12: memref<1x128xf32, #tpu.memory_space<vmem>>, %arg13: memref<128x32xbf16, #tpu.memory_space<vmem>>, %arg14: memref<1x32xf32, #tpu.memory_space<vmem>>, %arg15: memref<1x32xf32, #tpu.memory_space<vmem>>, %arg16: memref<1x5x32xf32, #tpu.memory_space<vmem>>) attributes {dimension_semantics = [#tpu.dimension_semantics<parallel>], iteration_bounds = array<i64: 2>, scalar_prefetch = 0 : i64, scratch_operands = 0 : i64, tpu.core_type = #tpu.core_type<tc>, window_params = [{transform_indices = @transform_0, window_bounds = array<i64: 1, 5, 32>}, {pipeline_mode = #tpu.pipeline_mode<synchronous>, transform_indices = @transform_1, window_bounds = array<i64: 1, 32>}, {pipeline_mode = #tpu.pipeline_mode<synchronous>, transform_indices = @transform_2, window_bounds = array<i64: 1, 32>}, {pipeline_mode = #tpu.pipeline_mode<synchronous>, transform_indices = @transform_3, window_bounds = array<i64: 32, 96>}, {pipeline_mode = #tpu.pipeline_mode<synchronous>, transform_indices = @transform_4, window_bounds = array<i64: 1, 96>}, {pipeline_mode = #tpu.pipeline_mode<synchronous>, transform_indices = @transform_5, window_bounds = array<i64: 32, 32>}, {pipeline_mode = #tpu.pipeline_mode<synchronous>, transform_indices = @transform_6, window_bounds = array<i64: 1, 32>}, {pipeline_mode = #tpu.pipeline_mode<synchronous>, transform_indices = @transform_7, window_bounds = array<i64: 1, 32>}, {pipeline_mode = #tpu.pipeline_mode<synchronous>, transform_indices = @transform_8, window_bounds = array<i64: 1, 32>}, {pipeline_mode = #tpu.pipeline_mode<synchronous>, transform_indices = @transform_9, window_bounds = array<i64: 1, 32>}, {pipeline_mode = #tpu.pipeline_mode<synchronous>, transform_indices = @transform_10, window_bounds = array<i64: 32, 128>}, {pipeline_mode = #tpu.pipeline_mode<synchronous>, transform_indices = @transform_11, window_bounds = array<i64: 1, 128>}, {pipeline_mode = #tpu.pipeline_mode<synchronous>, transform_indices = @transform_12, window_bounds = array<i64: 128, 32>}, {pipeline_mode = #tpu.pipeline_mode<synchronous>, transform_indices = @transform_13, window_bounds = array<i64: 1, 32>}, {pipeline_mode = #tpu.pipeline_mode<synchronous>, transform_indices = @transform_14, window_bounds = array<i64: 1, 32>}, {transform_indices = @transform_15, window_bounds = array<i64: 1, 5, 32>}]} {
    %c0 = arith.constant 0 : index
    %c0_0 = arith.constant 0 : index
    %c0_1 = arith.constant 0 : index
    %0 = vector.load %arg1[%c0, %c0_0, %c0_1] : memref<1x5x32xf32, #tpu.memory_space<vmem>>, vector<1x5x32xf32>
    %1 = vector.shape_cast %0 : vector<1x5x32xf32> to vector<5x32xf32>
    %c0_2 = arith.constant 0 : index
    %c0_3 = arith.constant 0 : index
    %2 = vector.load %arg2[%c0_2, %c0_3] : memref<1x32xf32, #tpu.memory_space<vmem>>, vector<1x32xf32>
    %c0_4 = arith.constant 0 : index
    %c0_5 = arith.constant 0 : index
    %3 = vector.load %arg3[%c0_4, %c0_5] : memref<1x32xf32, #tpu.memory_space<vmem>>, vector<1x32xf32>
    %cst = arith.constant dense<0.000000e+00> : vector<5xf32>
    %4 = vector.multi_reduction <add>, %1, %cst [1] : vector<5x32xf32> to vector<5xf32>
    %5 = vector.shape_cast %4 : vector<5xf32> to vector<5x1xf32>
    %cst_6 = arith.constant 3.200000e+01 : f32
    %6 = vector.broadcast %cst_6 : f32 to vector<5x1xf32>
    %7 = arith.divf %5, %6 : vector<5x1xf32>
    %8 = vector.broadcast %7 : vector<5x1xf32> to vector<5x32xf32>
    %9 = arith.subf %1, %8 : vector<5x32xf32>
    %10 = arith.mulf %9, %9 : vector<5x32xf32>
    %cst_7 = arith.constant dense<0.000000e+00> : vector<5xf32>
    %11 = vector.multi_reduction <add>, %10, %cst_7 [1] : vector<5x32xf32> to vector<5xf32>
    %12 = vector.shape_cast %11 : vector<5xf32> to vector<5x1xf32>
    %cst_8 = arith.constant 3.200000e+01 : f32
    %13 = vector.broadcast %cst_8 : f32 to vector<5x1xf32>
    %14 = arith.divf %12, %13 : vector<5x1xf32>
    %15 = vector.broadcast %7 : vector<5x1xf32> to vector<5x32xf32>
    %16 = arith.subf %1, %15 : vector<5x32xf32>
    %cst_9 = arith.constant 9.99999997E-7 : f32
    %17 = vector.broadcast %cst_9 : f32 to vector<5x1xf32>
    %18 = arith.addf %14, %17 : vector<5x1xf32>
    %19 = math.rsqrt %18 : vector<5x1xf32>
    %20 = vector.broadcast %19 : vector<5x1xf32> to vector<5x32xf32>
    %21 = arith.mulf %16, %20 : vector<5x32xf32>
    %22 = vector.broadcast %2 : vector<1x32xf32> to vector<5x32xf32>
    %23 = arith.mulf %21, %22 : vector<5x32xf32>
    %24 = vector.broadcast %3 : vector<1x32xf32> to vector<5x32xf32>
    %25 = arith.addf %23, %24 : vector<5x32xf32>
    %26 = arith.truncf %25 : vector<5x32xf32> to vector<5x32xbf16>
    %c0_10 = arith.constant 0 : index
    %c0_11 = arith.constant 0 : index
    %27 = vector.load %arg4[%c0_10, %c0_11] : memref<32x96xbf16, #tpu.memory_space<vmem>>, vector<32x96xbf16>
    %cst_12 = arith.constant dense<0.000000e+00> : vector<5x96xf32>
    %28 = tpu.matmul %26, %27, %cst_12 {dimension_numbers = #tpu.dot_dimension_numbers<[1], [0], [0], [1], [0, 0, 1, 1], [], []>} : vector<5x32xbf16>, vector<32x96xbf16>, vector<5x96xf32> -> vector<5x96xf32>
    %c0_13 = arith.constant 0 : index
    %c0_14 = arith.constant 0 : index
    %29 = vector.load %arg5[%c0_13, %c0_14] : memref<1x96xf32, #tpu.memory_space<vmem>>, vector<1x96xf32>
    %30 = vector.broadcast %29 : vector<1x96xf32> to vector<5x96xf32>
    %31 = arith.addf %28, %30 : vector<5x96xf32>
    %cst_15 = arith.constant 0.000000e+00 : f32
    %32 = vector.broadcast %cst_15 : f32 to vector<5x32xf32>
    %33 = vector.extract_strided_slice %31 {offsets = [0, 0], sizes = [5, 16], strides = [1, 1]} : vector<5x96xf32> to vector<5x16xf32>
    %cst_16 = arith.constant 2.500000e-01 : f32
    %34 = vector.broadcast %cst_16 : f32 to vector<5x16xf32>
    %35 = arith.mulf %33, %34 : vector<5x16xf32>
    %36 = vector.extract_strided_slice %31 {offsets = [0, 32], sizes = [5, 16], strides = [1, 1]} : vector<5x96xf32> to vector<5x16xf32>
    %37 = vector.extract_strided_slice %31 {offsets = [0, 64], sizes = [5, 16], strides = [1, 1]} : vector<5x96xf32> to vector<5x16xf32>
    %38 = arith.truncf %35 : vector<5x16xf32> to vector<5x16xbf16>
    %39 = arith.truncf %36 : vector<5x16xf32> to vector<5x16xbf16>
    %cst_17 = arith.constant dense<0.000000e+00> : vector<5x5xf32>
    %40 = tpu.matmul %38, %39, %cst_17 {dimension_numbers = #tpu.dot_dimension_numbers<[1], [1], [0], [0], [0, 0, 1, 0], [], []>} : vector<5x16xbf16>, vector<5x16xbf16>, vector<5x5xf32> -> vector<5x5xf32>
    %cst_18 = arith.constant dense<0xFF800000> : vector<5xf32>
    %41 = vector.multi_reduction <maximumf>, %40, %cst_18 [1] : vector<5x5xf32> to vector<5xf32>
    %42 = vector.shape_cast %41 : vector<5xf32> to vector<5x1xf32>
    %43 = vector.broadcast %42 : vector<5x1xf32> to vector<5x5xf32>
    %44 = arith.subf %40, %43 : vector<5x5xf32>
    %45 = math.exp %44 : vector<5x5xf32>
    %cst_19 = arith.constant dense<0.000000e+00> : vector<5xf32>
    %46 = vector.multi_reduction <add>, %45, %cst_19 [1] : vector<5x5xf32> to vector<5xf32>
    %47 = vector.shape_cast %46 : vector<5xf32> to vector<5x1xf32>
    %48 = tpu.reciprocal %47 {approx = true} : vector<5x1xf32> -> vector<5x1xf32>
    %49 = vector.broadcast %48 : vector<5x1xf32> to vector<5x5xf32>
    %50 = arith.mulf %45, %49 : vector<5x5xf32>
    %51 = arith.truncf %50 : vector<5x5xf32> to vector<5x5xbf16>
    %52 = arith.truncf %37 : vector<5x16xf32> to vector<5x16xbf16>
    %cst_20 = arith.constant dense<0.000000e+00> : vector<5x16xf32>
    %53 = tpu.matmul %51, %52, %cst_20 {dimension_numbers = #tpu.dot_dimension_numbers<[1], [0], [0], [1], [0, 0, 1, 1], [], []>} : vector<5x5xbf16>, vector<5x16xbf16>, vector<5x16xf32> -> vector<5x16xf32>
    %54 = arith.truncf %53 : vector<5x16xf32> to vector<5x16xbf16>
    %c0_21 = arith.constant 0 : index
    %c0_22 = arith.constant 0 : index
    %55 = vector.load %arg6[%c0_21, %c0_22] : memref<32x32xbf16, #tpu.memory_space<vmem>>, vector<16x32xbf16>
    %cst_23 = arith.constant dense<0.000000e+00> : vector<5x32xf32>
    %56 = tpu.matmul %54, %55, %cst_23 {dimension_numbers = #tpu.dot_dimension_numbers<[1], [0], [0], [1], [0, 0, 1, 1], [], []>} : vector<5x16xbf16>, vector<16x32xbf16>, vector<5x32xf32> -> vector<5x32xf32>
    %57 = arith.addf %32, %56 : vector<5x32xf32>
    %58 = vector.extract_strided_slice %31 {offsets = [0, 16], sizes = [5, 16], strides = [1, 1]} : vector<5x96xf32> to vector<5x16xf32>
    %cst_24 = arith.constant 2.500000e-01 : f32
    %59 = vector.broadcast %cst_24 : f32 to vector<5x16xf32>
    %60 = arith.mulf %58, %59 : vector<5x16xf32>
    %61 = vector.extract_strided_slice %31 {offsets = [0, 48], sizes = [5, 16], strides = [1, 1]} : vector<5x96xf32> to vector<5x16xf32>
    %62 = vector.extract_strided_slice %31 {offsets = [0, 80], sizes = [5, 16], strides = [1, 1]} : vector<5x96xf32> to vector<5x16xf32>
    %63 = arith.truncf %60 : vector<5x16xf32> to vector<5x16xbf16>
    %64 = arith.truncf %61 : vector<5x16xf32> to vector<5x16xbf16>
    %cst_25 = arith.constant dense<0.000000e+00> : vector<5x5xf32>
    %65 = tpu.matmul %63, %64, %cst_25 {dimension_numbers = #tpu.dot_dimension_numbers<[1], [1], [0], [0], [0, 0, 1, 0], [], []>} : vector<5x16xbf16>, vector<5x16xbf16>, vector<5x5xf32> -> vector<5x5xf32>
    %cst_26 = arith.constant dense<0xFF800000> : vector<5xf32>
    %66 = vector.multi_reduction <maximumf>, %65, %cst_26 [1] : vector<5x5xf32> to vector<5xf32>
    %67 = vector.shape_cast %66 : vector<5xf32> to vector<5x1xf32>
    %68 = vector.broadcast %67 : vector<5x1xf32> to vector<5x5xf32>
    %69 = arith.subf %65, %68 : vector<5x5xf32>
    %70 = math.exp %69 : vector<5x5xf32>
    %cst_27 = arith.constant dense<0.000000e+00> : vector<5xf32>
    %71 = vector.multi_reduction <add>, %70, %cst_27 [1] : vector<5x5xf32> to vector<5xf32>
    %72 = vector.shape_cast %71 : vector<5xf32> to vector<5x1xf32>
    %73 = tpu.reciprocal %72 {approx = true} : vector<5x1xf32> -> vector<5x1xf32>
    %74 = vector.broadcast %73 : vector<5x1xf32> to vector<5x5xf32>
    %75 = arith.mulf %70, %74 : vector<5x5xf32>
    %76 = arith.truncf %75 : vector<5x5xf32> to vector<5x5xbf16>
    %77 = arith.truncf %62 : vector<5x16xf32> to vector<5x16xbf16>
    %cst_28 = arith.constant dense<0.000000e+00> : vector<5x16xf32>
    %78 = tpu.matmul %76, %77, %cst_28 {dimension_numbers = #tpu.dot_dimension_numbers<[1], [0], [0], [1], [0, 0, 1, 1], [], []>} : vector<5x5xbf16>, vector<5x16xbf16>, vector<5x16xf32> -> vector<5x16xf32>
    %79 = arith.truncf %78 : vector<5x16xf32> to vector<5x16xbf16>
    %c16 = arith.constant 16 : index
    %c0_29 = arith.constant 0 : index
    %80 = vector.load %arg6[%c16, %c0_29] : memref<32x32xbf16, #tpu.memory_space<vmem>>, vector<16x32xbf16>
    %cst_30 = arith.constant dense<0.000000e+00> : vector<5x32xf32>
    %81 = tpu.matmul %79, %80, %cst_30 {dimension_numbers = #tpu.dot_dimension_numbers<[1], [0], [0], [1], [0, 0, 1, 1], [], []>} : vector<5x16xbf16>, vector<16x32xbf16>, vector<5x32xf32> -> vector<5x32xf32>
    %82 = arith.addf %57, %81 : vector<5x32xf32>
    %c0_31 = arith.constant 0 : index
    %c0_32 = arith.constant 0 : index
    %83 = vector.load %arg7[%c0_31, %c0_32] : memref<1x32xf32, #tpu.memory_space<vmem>>, vector<1x32xf32>
    %84 = vector.broadcast %83 : vector<1x32xf32> to vector<5x32xf32>
    %85 = arith.addf %82, %84 : vector<5x32xf32>
    %c0_33 = arith.constant 0 : index
    %c0_34 = arith.constant 0 : index
    %86 = vector.load %arg8[%c0_33, %c0_34] : memref<1x32xf32, #tpu.memory_space<vmem>>, vector<1x32xf32>
    %87 = vector.broadcast %86 : vector<1x32xf32> to vector<5x32xf32>
    %88 = arith.mulf %85, %87 : vector<5x32xf32>
    %89 = arith.addf %1, %88 : vector<5x32xf32>
    %c0_35 = arith.constant 0 : index
    %c0_36 = arith.constant 0 : index
    %90 = vector.load %arg9[%c0_35, %c0_36] : memref<1x32xf32, #tpu.memory_space<vmem>>, vector<1x32xf32>
    %c0_37 = arith.constant 0 : index
    %c0_38 = arith.constant 0 : index
    %91 = vector.load %arg10[%c0_37, %c0_38] : memref<1x32xf32, #tpu.memory_space<vmem>>, vector<1x32xf32>
    %cst_39 = arith.constant dense<0.000000e+00> : vector<5xf32>
    %92 = vector.multi_reduction <add>, %89, %cst_39 [1] : vector<5x32xf32> to vector<5xf32>
    %93 = vector.shape_cast %92 : vector<5xf32> to vector<5x1xf32>
    %cst_40 = arith.constant 3.200000e+01 : f32
    %94 = vector.broadcast %cst_40 : f32 to vector<5x1xf32>
    %95 = arith.divf %93, %94 : vector<5x1xf32>
    %96 = vector.broadcast %95 : vector<5x1xf32> to vector<5x32xf32>
    %97 = arith.subf %89, %96 : vector<5x32xf32>
    %98 = arith.mulf %97, %97 : vector<5x32xf32>
    %cst_41 = arith.constant dense<0.000000e+00> : vector<5xf32>
    %99 = vector.multi_reduction <add>, %98, %cst_41 [1] : vector<5x32xf32> to vector<5xf32>
    %100 = vector.shape_cast %99 : vector<5xf32> to vector<5x1xf32>
    %cst_42 = arith.constant 3.200000e+01 : f32
    %101 = vector.broadcast %cst_42 : f32 to vector<5x1xf32>
    %102 = arith.divf %100, %101 : vector<5x1xf32>
    %103 = vector.broadcast %95 : vector<5x1xf32> to vector<5x32xf32>
    %104 = arith.subf %89, %103 : vector<5x32xf32>
    %cst_43 = arith.constant 9.99999997E-7 : f32
    %105 = vector.broadcast %cst_43 : f32 to vector<5x1xf32>
    %106 = arith.addf %102, %105 : vector<5x1xf32>
    %107 = math.rsqrt %106 : vector<5x1xf32>
    %108 = vector.broadcast %107 : vector<5x1xf32> to vector<5x32xf32>
    %109 = arith.mulf %104, %108 : vector<5x32xf32>
    %110 = vector.broadcast %90 : vector<1x32xf32> to vector<5x32xf32>
    %111 = arith.mulf %109, %110 : vector<5x32xf32>
    %112 = vector.broadcast %91 : vector<1x32xf32> to vector<5x32xf32>
    %113 = arith.addf %111, %112 : vector<5x32xf32>
    %114 = arith.truncf %113 : vector<5x32xf32> to vector<5x32xbf16>
    %c0_44 = arith.constant 0 : index
    %c0_45 = arith.constant 0 : index
    %115 = vector.load %arg11[%c0_44, %c0_45] : memref<32x128xbf16, #tpu.memory_space<vmem>>, vector<32x128xbf16>
    %cst_46 = arith.constant dense<0.000000e+00> : vector<5x128xf32>
    %116 = tpu.matmul %114, %115, %cst_46 {dimension_numbers = #tpu.dot_dimension_numbers<[1], [0], [0], [1], [0, 0, 1, 1], [], []>} : vector<5x32xbf16>, vector<32x128xbf16>, vector<5x128xf32> -> vector<5x128xf32>
    %c0_47 = arith.constant 0 : index
    %c0_48 = arith.constant 0 : index
    %117 = vector.load %arg12[%c0_47, %c0_48] : memref<1x128xf32, #tpu.memory_space<vmem>>, vector<1x128xf32>
    %118 = vector.broadcast %117 : vector<1x128xf32> to vector<5x128xf32>
    %119 = arith.addf %116, %118 : vector<5x128xf32>
    %cst_49 = arith.constant 5.000000e-01 : f32
    %120 = vector.broadcast %cst_49 : f32 to vector<5x128xf32>
    %121 = arith.mulf %120, %119 : vector<5x128xf32>
    %cst_50 = arith.constant 4.471500e-02 : f32
    %122 = vector.broadcast %cst_50 : f32 to vector<5x128xf32>
    %123 = arith.mulf %122, %119 : vector<5x128xf32>
    %124 = arith.mulf %123, %119 : vector<5x128xf32>
    %125 = arith.mulf %124, %119 : vector<5x128xf32>
    %126 = arith.addf %119, %125 : vector<5x128xf32>
    %cst_51 = arith.constant 0.797884583 : f32
    %127 = vector.broadcast %cst_51 : f32 to vector<5x128xf32>
    %128 = arith.mulf %127, %126 : vector<5x128xf32>
    %129 = math.tanh %128 : vector<5x128xf32>
    %cst_52 = arith.constant 1.000000e+00 : f32
    %130 = vector.broadcast %cst_52 : f32 to vector<5x128xf32>
    %131 = arith.addf %130, %129 : vector<5x128xf32>
    %132 = arith.mulf %121, %131 : vector<5x128xf32>
    %133 = arith.truncf %132 : vector<5x128xf32> to vector<5x128xbf16>
    %c0_53 = arith.constant 0 : index
    %c0_54 = arith.constant 0 : index
    %134 = vector.load %arg13[%c0_53, %c0_54] : memref<128x32xbf16, #tpu.memory_space<vmem>>, vector<128x32xbf16>
    %cst_55 = arith.constant dense<0.000000e+00> : vector<5x32xf32>
    %135 = tpu.matmul %133, %134, %cst_55 {dimension_numbers = #tpu.dot_dimension_numbers<[1], [0], [0], [1], [0, 0, 1, 1], [], []>} : vector<5x128xbf16>, vector<128x32xbf16>, vector<5x32xf32> -> vector<5x32xf32>
    %c0_56 = arith.constant 0 : index
    %c0_57 = arith.constant 0 : index
    %136 = vector.load %arg14[%c0_56, %c0_57] : memref<1x32xf32, #tpu.memory_space<vmem>>, vector<1x32xf32>
    %137 = vector.broadcast %136 : vector<1x32xf32> to vector<5x32xf32>
    %138 = arith.addf %135, %137 : vector<5x32xf32>
    %c0_58 = arith.constant 0 : index
    %c0_59 = arith.constant 0 : index
    %139 = vector.load %arg15[%c0_58, %c0_59] : memref<1x32xf32, #tpu.memory_space<vmem>>, vector<1x32xf32>
    %140 = vector.broadcast %139 : vector<1x32xf32> to vector<5x32xf32>
    %141 = arith.mulf %138, %140 : vector<5x32xf32>
    %142 = arith.addf %89, %141 : vector<5x32xf32>
    %c0_60 = arith.constant 0 : index
    %c0_61 = arith.constant 0 : index
    %c0_62 = arith.constant 0 : index
    %143 = vector.load %arg16[%c0_60, %c0_61, %c0_62] : memref<1x5x32xf32, #tpu.memory_space<vmem>>, vector<1x5x32xf32>
    %144 = vector.shape_cast %143 : vector<1x5x32xf32> to vector<5x32xf32>
    %145 = vector.shape_cast %142 : vector<5x32xf32> to vector<1x5x32xf32>
    tpu.vector_store %arg16[%c0_60, %c0_61, %c0_62], %145 {strides = array<i32>} : memref<1x5x32xf32, #tpu.memory_space<vmem>>, vector<1x5x32xf32>,
    return
  }
  func.func @transform_0(%arg0: i32) -> (i32, i32, i32) {
    %c0_i32 = arith.constant 0 : i32
    %c0_i32_0 = arith.constant 0 : i32
    %c0_i32_1 = arith.constant 0 : i32
    return %arg0, %c0_i32, %c0_i32_0 : i32, i32, i32
  }
  func.func @transform_1(%arg0: i32) -> (i32, i32) {
    %c0_i32 = arith.constant 0 : i32
    %c0_i32_0 = arith.constant 0 : i32
    %c0_i32_1 = arith.constant 0 : i32
    return %c0_i32, %c0_i32_0 : i32, i32
  }
  func.func @transform_2(%arg0: i32) -> (i32, i32) {
    %c0_i32 = arith.constant 0 : i32
    %c0_i32_0 = arith.constant 0 : i32
    %c0_i32_1 = arith.constant 0 : i32
    return %c0_i32, %c0_i32_0 : i32, i32
  }
  func.func @transform_3(%arg0: i32) -> (i32, i32) {
    %c0_i32 = arith.constant 0 : i32
    %c0_i32_0 = arith.constant 0 : i32
    %c0_i32_1 = arith.constant 0 : i32
    return %c0_i32, %c0_i32_0 : i32, i32
  }
  func.func @transform_4(%arg0: i32) -> (i32, i32) {
    %c0_i32 = arith.constant 0 : i32
    %c0_i32_0 = arith.constant 0 : i32
    %c0_i32_1 = arith.constant 0 : i32
    return %c0_i32, %c0_i32_0 : i32, i32
  }
  func.func @transform_5(%arg0: i32) -> (i32, i32) {
    %c0_i32 = arith.constant 0 : i32
    %c0_i32_0 = arith.constant 0 : i32
    %c0_i32_1 = arith.constant 0 : i32
    return %c0_i32, %c0_i32_0 : i32, i32
  }
  func.func @transform_6(%arg0: i32) -> (i32, i32) {
    %c0_i32 = arith.constant 0 : i32
    %c0_i32_0 = arith.constant 0 : i32
    %c0_i32_1 = arith.constant 0 : i32
    return %c0_i32, %c0_i32_0 : i32, i32
  }
  func.func @transform_7(%arg0: i32) -> (i32, i32) {
    %c0_i32 = arith.constant 0 : i32
    %c0_i32_0 = arith.constant 0 : i32
    %c0_i32_1 = arith.constant 0 : i32
    return %c0_i32, %c0_i32_0 : i32, i32
  }
  func.func @transform_8(%arg0: i32) -> (i32, i32) {
    %c0_i32 = arith.constant 0 : i32
    %c0_i32_0 = arith.constant 0 : i32
    %c0_i32_1 = arith.constant 0 : i32
    return %c0_i32, %c0_i32_0 : i32, i32
  }
  func.func @transform_9(%arg0: i32) -> (i32, i32) {
    %c0_i32 = arith.constant 0 : i32
    %c0_i32_0 = arith.constant 0 : i32
    %c0_i32_1 = arith.constant 0 : i32
    return %c0_i32, %c0_i32_0 : i32, i32
  }
  func.func @transform_10(%arg0: i32) -> (i32, i32) {
    %c0_i32 = arith.constant 0 : i32
    %c0_i32_0 = arith.constant 0 : i32
    %c0_i32_1 = arith.constant 0 : i32
    return %c0_i32, %c0_i32_0 : i32, i32
  }
  func.func @transform_11(%arg0: i32) -> (i32, i32) {
    %c0_i32 = arith.constant 0 : i32
    %c0_i32_0 = arith.constant 0 : i32
    %c0_i32_1 = arith.constant 0 : i32
    return %c0_i32, %c0_i32_0 : i32, i32
  }
  func.func @transform_12(%arg0: i32) -> (i32, i32) {
    %c0_i32 = arith.constant 0 : i32
    %c0_i32_0 = arith.constant 0 : i32
    %c0_i32_1 = arith.constant 0 : i32
    return %c0_i32, %c0_i32_0 : i32, i32
  }
  func.func @transform_13(%arg0: i32) -> (i32, i32) {
    %c0_i32 = arith.constant 0 : i32
    %c0_i32_0 = arith.constant 0 : i32
    %c0_i32_1 = arith.constant 0 : i32
    return %c0_i32, %c0_i32_0 : i32, i32
  }
  func.func @transform_14(%arg0: i32) -> (i32, i32) {
    %c0_i32 = arith.constant 0 : i32
    %c0_i32_0 = arith.constant 0 : i32
    %c0_i32_1 = arith.constant 0 : i32
    return %c0_i32, %c0_i32_0 : i32, i32
  }
  func.func @transform_15(%arg0: i32) -> (i32, i32, i32) {
    %c0_i32 = arith.constant 0 : i32
    %c0_i32_0 = arith.constant 0 : i32
    %c0_i32_1 = arith.constant 0 : i32
    return %arg0, %c0_i32, %c0_i32_0 : i32, i32, i32
  }
}

module attributes {stable_mosaic.version = 11 : i64} {
  func.func @_head_kernel(%arg0: i32, %arg1: memref<2x5x32xf32, #tpu.memory_space<vmem>>, %arg2: memref<1x32xf32, #tpu.memory_space<vmem>>, %arg3: memref<1x32xf32, #tpu.memory_space<vmem>>, %arg4: memref<32x1xbf16, #tpu.memory_space<vmem>>, %arg5: memref<1x1xf32, #tpu.memory_space<vmem>>, %arg6: memref<2x32xf32, #tpu.memory_space<vmem>>, %arg7: memref<2x1xf32, #tpu.memory_space<vmem>>) attributes {dimension_semantics = [#tpu.dimension_semantics<arbitrary>], iteration_bounds = array<i64: 1>, scalar_prefetch = 0 : i64, scratch_operands = 0 : i64, tpu.core_type = #tpu.core_type<tc>, window_params = [{pipeline_mode = #tpu.pipeline_mode<synchronous>, transform_indices = @transform_0, window_bounds = array<i64: 2, 5, 32>}, {pipeline_mode = #tpu.pipeline_mode<synchronous>, transform_indices = @transform_1, window_bounds = array<i64: 1, 32>}, {pipeline_mode = #tpu.pipeline_mode<synchronous>, transform_indices = @transform_2, window_bounds = array<i64: 1, 32>}, {pipeline_mode = #tpu.pipeline_mode<synchronous>, transform_indices = @transform_3, window_bounds = array<i64: 32, 1>}, {pipeline_mode = #tpu.pipeline_mode<synchronous>, transform_indices = @transform_4, window_bounds = array<i64: 1, 1>}, {pipeline_mode = #tpu.pipeline_mode<synchronous>, transform_indices = @transform_5, window_bounds = array<i64: 2, 32>}, {pipeline_mode = #tpu.pipeline_mode<synchronous>, transform_indices = @transform_6, window_bounds = array<i64: 2, 1>}]} {
    %c0 = arith.constant 0 : index
    %c0_0 = arith.constant 0 : index
    %c0_1 = arith.constant 0 : index
    %0 = vector.load %arg1[%c0, %c0_0, %c0_1] : memref<2x5x32xf32, #tpu.memory_space<vmem>>, vector<2x1x32xf32>
    %1 = vector.shape_cast %0 : vector<2x1x32xf32> to vector<2x32xf32>
    %c0_2 = arith.constant 0 : index
    %c0_3 = arith.constant 0 : index
    %2 = vector.load %arg2[%c0_2, %c0_3] : memref<1x32xf32, #tpu.memory_space<vmem>>, vector<1x32xf32>
    %c0_4 = arith.constant 0 : index
    %c0_5 = arith.constant 0 : index
    %3 = vector.load %arg3[%c0_4, %c0_5] : memref<1x32xf32, #tpu.memory_space<vmem>>, vector<1x32xf32>
    %cst = arith.constant dense<0.000000e+00> : vector<2xf32>
    %4 = vector.multi_reduction <add>, %1, %cst [1] : vector<2x32xf32> to vector<2xf32>
    %5 = vector.shape_cast %4 : vector<2xf32> to vector<2x1xf32>
    %cst_6 = arith.constant 3.200000e+01 : f32
    %6 = vector.broadcast %cst_6 : f32 to vector<2x1xf32>
    %7 = arith.divf %5, %6 : vector<2x1xf32>
    %8 = vector.broadcast %7 : vector<2x1xf32> to vector<2x32xf32>
    %9 = arith.subf %1, %8 : vector<2x32xf32>
    %10 = arith.mulf %9, %9 : vector<2x32xf32>
    %cst_7 = arith.constant dense<0.000000e+00> : vector<2xf32>
    %11 = vector.multi_reduction <add>, %10, %cst_7 [1] : vector<2x32xf32> to vector<2xf32>
    %12 = vector.shape_cast %11 : vector<2xf32> to vector<2x1xf32>
    %cst_8 = arith.constant 3.200000e+01 : f32
    %13 = vector.broadcast %cst_8 : f32 to vector<2x1xf32>
    %14 = arith.divf %12, %13 : vector<2x1xf32>
    %15 = vector.broadcast %7 : vector<2x1xf32> to vector<2x32xf32>
    %16 = arith.subf %1, %15 : vector<2x32xf32>
    %cst_9 = arith.constant 9.99999997E-7 : f32
    %17 = vector.broadcast %cst_9 : f32 to vector<2x1xf32>
    %18 = arith.addf %14, %17 : vector<2x1xf32>
    %19 = math.rsqrt %18 : vector<2x1xf32>
    %20 = vector.broadcast %19 : vector<2x1xf32> to vector<2x32xf32>
    %21 = arith.mulf %16, %20 : vector<2x32xf32>
    %22 = vector.broadcast %2 : vector<1x32xf32> to vector<2x32xf32>
    %23 = arith.mulf %21, %22 : vector<2x32xf32>
    %24 = vector.broadcast %3 : vector<1x32xf32> to vector<2x32xf32>
    %25 = arith.addf %23, %24 : vector<2x32xf32>
    %c0_10 = arith.constant 0 : index
    %c0_11 = arith.constant 0 : index
    %26 = vector.load %arg6[%c0_10, %c0_11] : memref<2x32xf32, #tpu.memory_space<vmem>>, vector<2x32xf32>
    tpu.vector_store %arg6[%c0_10, %c0_11], %25 {strides = array<i32>} : memref<2x32xf32, #tpu.memory_space<vmem>>, vector<2x32xf32>,
    %27 = arith.truncf %25 : vector<2x32xf32> to vector<2x32xbf16>
    %c0_12 = arith.constant 0 : index
    %c0_13 = arith.constant 0 : index
    %28 = vector.load %arg4[%c0_12, %c0_13] : memref<32x1xbf16, #tpu.memory_space<vmem>>, vector<32x1xbf16>
    %cst_14 = arith.constant dense<0.000000e+00> : vector<2x1xf32>
    %29 = tpu.matmul %27, %28, %cst_14 {dimension_numbers = #tpu.dot_dimension_numbers<[1], [0], [0], [1], [0, 0, 1, 1], [], []>} : vector<2x32xbf16>, vector<32x1xbf16>, vector<2x1xf32> -> vector<2x1xf32>
    %c0_15 = arith.constant 0 : index
    %c0_16 = arith.constant 0 : index
    %30 = vector.load %arg5[%c0_15, %c0_16] : memref<1x1xf32, #tpu.memory_space<vmem>>, vector<1x1xf32>
    %31 = vector.broadcast %30 : vector<1x1xf32> to vector<2x1xf32>
    %32 = arith.addf %29, %31 : vector<2x1xf32>
    %c0_17 = arith.constant 0 : index
    %c0_18 = arith.constant 0 : index
    %33 = vector.load %arg7[%c0_17, %c0_18] : memref<2x1xf32, #tpu.memory_space<vmem>>, vector<2x1xf32>
    tpu.vector_store %arg7[%c0_17, %c0_18], %32 {strides = array<i32>} : memref<2x1xf32, #tpu.memory_space<vmem>>, vector<2x1xf32>,
    return
  }
  func.func @transform_0(%arg0: i32) -> (i32, i32, i32) {
    %c0_i32 = arith.constant 0 : i32
    %c0_i32_0 = arith.constant 0 : i32
    %c0_i32_1 = arith.constant 0 : i32
    %c0_i32_2 = arith.constant 0 : i32
    return %c0_i32, %c0_i32_0, %c0_i32_1 : i32, i32, i32
  }
  func.func @transform_1(%arg0: i32) -> (i32, i32) {
    %c0_i32 = arith.constant 0 : i32
    %c0_i32_0 = arith.constant 0 : i32
    %c0_i32_1 = arith.constant 0 : i32
    return %c0_i32, %c0_i32_0 : i32, i32
  }
  func.func @transform_2(%arg0: i32) -> (i32, i32) {
    %c0_i32 = arith.constant 0 : i32
    %c0_i32_0 = arith.constant 0 : i32
    %c0_i32_1 = arith.constant 0 : i32
    return %c0_i32, %c0_i32_0 : i32, i32
  }
  func.func @transform_3(%arg0: i32) -> (i32, i32) {
    %c0_i32 = arith.constant 0 : i32
    %c0_i32_0 = arith.constant 0 : i32
    %c0_i32_1 = arith.constant 0 : i32
    return %c0_i32, %c0_i32_0 : i32, i32
  }
  func.func @transform_4(%arg0: i32) -> (i32, i32) {
    %c0_i32 = arith.constant 0 : i32
    %c0_i32_0 = arith.constant 0 : i32
    %c0_i32_1 = arith.constant 0 : i32
    return %c0_i32, %c0_i32_0 : i32, i32
  }
  func.func @transform_5(%arg0: i32) -> (i32, i32) {
    %c0_i32 = arith.constant 0 : i32
    %c0_i32_0 = arith.constant 0 : i32
    %c0_i32_1 = arith.constant 0 : i32
    return %c0_i32, %c0_i32_0 : i32, i32
  }
  func.func @transform_6(%arg0: i32) -> (i32, i32) {
    %c0_i32 = arith.constant 0 : i32
    %c0_i32_0 = arith.constant 0 : i32
    %c0_i32_1 = arith.constant 0 : i32
    return %c0_i32, %c0_i32_0 : i32, i32
  }
}

</mosaic_0001>

<bundles_post_ra>
// kernel: dinov2_forward.4
= control target key start
LH: loop header
LB: loop body
LE: loop exit
PB: predicated region body
PF: predicated region fallthrough
CT: control target
= control target key end

     0   :  { %s544_s18 = smov 0   ;;  %s616_s0 = inlined_call_operand.vmem [shape: f32[2,4,192], index: 0, kind: input, shape index: {}]   ;;  %s617_s1 = inlined_call_operand.vmem [shape: bf16[192,32], index: 1, kind: input, shape index: {}]   ;;  %s618_s2 = inlined_call_operand.vmem [shape: f32[1,32], index: 2, kind: input, shape index: {}]   ;;  %s619_s3 = inlined_call_operand.vmem [shape: f32[1,32], index: 3, kind: input, shape index: {}]   ;;  %s620_s4 = inlined_call_operand.vmem [shape: f32[1,5,32], index: 4, kind: input, shape index: {}]   ;;  %s621_s5 = inlined_call_operand.vmem [shape: f32[2,5,32], index: 5, kind: output, shape index: {}]  }
   0x1 LB: > { %s425_s19 = sadd.s32 4294967295, %s512_s18   ;;  %p429_p0 = scmp.ge.s32.totalorder %s512_s18, 1  ;;  %s512_s18 = sphi %s544_s18, %s15_s18  }
   0x2   : > { %p187_p1 = scmp.lt.s32.totalorder %s512_s18, 3 }
   0x4   : > { %p188_p2 = pnand %p429_p0, %p187_p1 }
   0x5   : > { %p214_p3 = scmp.lt.s32.totalorder (!%p188_p2), %s425_s19, 1 }
   0x6   : > { %191 = sbr.rel (%p188_p2) target bundleno = 177 (0xb1), region = 40 }
   0xb   : > { %v492_v0 = vld [vmem:[%s617_s1 + $0x38] sm:$0xff]  ;;  %v491_v2 = vld [vmem:[%s617_s1 + $0x30] sm:$0xff]  ;;  %s623_s19 = smov (!%p214_p3, %s425_s19), 1  ;;  %v490_v4 = vld [vmem:[%s617_s1 + $0x28] sm:$0xff]  ;;  %vm333_vm0 = vcmask 523264   ;;  %vm366_vm1 = vcmask 253952  }
   0xc   : > { %v496_v1 = vld [vmem:[%s617_s1 + $0x58] sm:$0xff]  ;;  %337 = vmatpush.bf16.msra.mxu0 %v492_v0  ;;  %v495_v3 = vld [vmem:[%s617_s1 + $0x50] sm:$0xff]  ;;  %s484_s28 = sshll.u32 %s623_s19, 3  ;;  %v494_v6 = vld [vmem:[%s617_s1 + $0x48] sm:$0xff]  ;;  %vm370_vm2 = vcmask 257024  }
   0xd   : > { %354 = vmatpush.bf16.msra.mxu1 %v496_v1  ;;  %s218_s6 = scalar_lea.vmem %s616_s0, %s484_s28  ;;  %v489_v7 = vld [vmem:[%s617_s1 + $0x20] sm:$0xff]  ;;  %v488_v9 = vld [vmem:[%s617_s1 + $0x18] sm:$0xff]  ;;  %v487_v12 = vld [vmem:[%s617_s1 + $0x10] sm:$0xff]  ;;  %s222_s27 = scalar_lea.vmem %s621_s5, %s484_s28 }
   0xe   : > { %v224_v5 = vld [vmem:[%s218_s6] sm:$0xff]  ;;  %v486_v13 = vld [vmem:[%s617_s1 + $0x8] sm:$0xff] }
   0xf   : > { %226 = vst [vmem:[#allocation1] ss:$2 sm:$0xff] %v224_v5  ;;  %v493_v8 = vld [vmem:[%s617_s1 + $0x40] sm:$0xff] }
  0x10   : > { %338 = vmatpush.bf16.msra.mxu0 %v491_v2  ;;  %v485_v14 = vld [vmem:[%s617_s1] sm:$0xff] }
  0x11   : > { %355 = vmatpush.bf16.msra.mxu1 %v495_v3  ;;  %v363_v17 = vld [vmem:[%s619_s3] sm:$0x1]  ;;  %v368_v25 = vld [vmem:[%s620_s4 + $0x1] sm:$0xf] }
  0x12   : > { %v364_v18 = vld [vmem:[%s620_s4] sm:$0x1] }
  0x13   : > { %v365_v19 = vadd.f32 %v364_v18, %v363_v17  ;;  %v505_v22 = vld [vmem:[%s618_s2] ss:$0 sm:$0xff] }
  0x14   : > { %339 = vmatpush.bf16.msra.mxu0 %v490_v4 }
  0x15   : > { %356 = vmatpush.bf16.msra.mxu1 %v494_v6  ;;  %367 = vst.msk [vmem:[%s222_s27] sm:$0x1] %vm366_vm1, %v365_v19 }
  0x16   : > { %v228_v10 = vld.sshfl [vmem:[#allocation1 + $0x8] sm:$0xff pattern:$0x75316420]  ;;  %v227_v15 = vld.sshfl [vmem:[#allocation1] sm:$0xff pattern:$0x75316420] }
  0x17   : > { %v232_v11 = vpack.c.bf16 %v228_v10, %v228_v10  ;;  %v231_v16 = vpack.c.bf16 %v227_v15, %v227_v15 }
  0x18   : > { %340 = vmatpush.bf16.msra.mxu0 %v489_v7 }
  0x19   : > { %357 = vmatpush.bf16.msra.mxu1 %v493_v8 }
  0x1c   : > { %341 = vmatpush.bf16.msra.mxu0 %v488_v9  ;;  %481 = vmatmul.msk.bf16.vlgmr.msra.gmra.mxu1 %vm333_vm0, %v232_v11 }
  0x20   : > { %342 = vmatpush.bf16.msra.mxu0 %v487_v12 }
  0x24   : > { %343 = vmatpush.bf16.msra.mxu0 %v486_v13 }
  0x28   : > { %344 = vmatpush.bf16.msra.mxu0 %v485_v14 }
  0x2b   : > { %345 = vmatmul.bf16.vlgmr.msra.gmra.mxu0 %v231_v16 }
  0x99   : > { %v359_v20 = vpop.f32.mrf.mxu1 }
  0xa1   : > { %v361_v21 = vpop.f32.mrf.mxu1 }
  0xa8   : > { %v346_v23 = vpop.f32.mrf.mxu0 }
  0xa9   : > { %v347_v24 = vadd.f32 %v505_v22, %v346_v23 }
  0xab   : > { %v360_v26 = vadd.f32 %v359_v20, %v347_v24 }
  0xad   : > { %v369_v27 = vadd.f32 %v368_v25, %v360_v26 }
  0xaf   : > { %371 = vst.msk [vmem:[%s222_s27 + $0x1] sm:$0xf] %vm370_vm2, %v369_v27 }
  0xb0   : > { %v348_v28 = vpop.f32.mrf.mxu0 }
  0xb1 PF: > { %s15_s18 = sadd.s32 1, %s512_s18  }
  0xb2   : > { %p12_p4 = scmp.ge.s32.totalorder %s15_s18, 4  }
  0xb4   :  { %14 = sbr.rel (!%p12_p4) target bundleno = 1 (0x1), region = 70 }

// kernel: dinov2_forward.7
= control target key start
LH: loop header
LB: loop body
LE: loop exit
PB: predicated region body
PF: predicated region fallthrough
CT: control target
= control target key end

     0   :  { %s283_s0 = inlined_call_operand.vmem [shape: f32[2,5,32], index: 0, kind: input, shape index: {}]   ;;  %s284_s1 = inlined_call_operand.vmem [shape: f32[1,32], index: 1, kind: input, shape index: {}]   ;;  %s285_s2 = inlined_call_operand.vmem [shape: f32[1,32], index: 2, kind: input, shape index: {}]   ;;  %s286_s3 = inlined_call_operand.vmem [shape: bf16[32,1], index: 3, kind: input, shape index: {}]   ;;  %s287_s4 = inlined_call_operand.<no memory space> [shape: f32[1,1], index: 4, kind: input, shape index: {}]   ;;  %s288_s5 = inlined_call_operand.hbm [shape: f32[2,32], index: 5, kind: output, shape index: {0}]   ;;  %s289_s6 = inlined_call_operand.vmem [shape: f32[2,1], index: 6, kind: output, shape index: {1}]  }
   0x1   :  { %v12_v0 = vstv %s287_s4 }
   0x2   :  { %13 = vst [vmem:[#allocation2] sm:$0x1] %v12_v0 }
   0x3   :  { %v26_v1 = vld [vmem:[%s283_s0] sm:$0x1]  ;;  %v27_v2 = vld [vmem:[%s283_s0 + $0x8] sm:$0x1]  ;;  %vm33_vm0 = vcmask 1041409   ;;  %vm36_vm1 = vcmask 254976  }
   0x4   :  { %v32_v3 = vrot.slane %v27_v2, 7 }
   0x5   :  { %14 = vsyncpa [#allocation4], 0  ;;  %v212_v6 = vmov 32.0   ;;  %v176_v23 = vld [vmem:[%s286_s3 + $0x8] sm:$0xff]  ;;  %v175_v24 = vld [vmem:[%s286_s3] sm:$0xff]  ;;  %vm127_vm6 = vcmask 261120  }
   0x6   :  { %v34_v4 = vsel %vm33_vm0, %v32_v3, %v26_v1  ;;  %182 = vrcp.f32 %v212_v6  ;;  %137 = vmatpush.bf16.msra.mxu0 %v176_v23  ;;  %v179_v34 = vld [vmem:[%s284_s1] ss:$0 sm:$0xff]  ;;  %s213_s1 = smov [#allocation3]   ;;  %s153_s10 = sshll.u32 %s288_s5, 4  ;;  %vm144_vm7 = vcmask 1024   ;;  %s154_s10 = int_to_ptr.hbm [resolvable:$true] %s153_s10 }
   0x7   :  { %v37_v5 = vsel %vm36_vm1, %v34_v4, 0.0  ;;  %v180_v38 = vld [vmem:[%s285_s2] ss:$0 sm:$0xff]  ;;  %s151_s2 = sshll.u32 %s213_s1, 4  ;;  %s152_s2 = int_to_ptr.vmem [resolvable:$true] %s151_s2 }
   0x8   :  { %38 = vadd.xlane.f32.xlu0 %v37_v5 }
   0x9   :  { %v181_v53 = vld [vmem:[#allocation2] ss:$0 sm:$0xff] }
   0xa   :  { %138 = vmatpush.bf16.msra.mxu0 %v175_v24 }
   0xc   :  { %v183_v7 = vpop.eup %182 }
   0xd   :  { %v41_v8 = vmul.f32 32.0, %v183_v7  ;;  %vm45_vm2 = vweird.f32 %v183_v7 }
   0xf   :  { %v42_v9 = vsub.f32 1.0, %v41_v8 }
  0x11   :  { %v43_v10 = vmul.f32 %v183_v7, %v42_v9 }
  0x13   :  { %v44_v11 = vadd.f32 %v183_v7, %v43_v10 }
  0x15   :  { %v46_v12 = vsel %vm45_vm2, %v183_v7, %v44_v11 }
  0x7b   :  { %v39_v13 = vpop.xlane.xlu0 %38 }
  0x7c   :  { %v47_v14 = vmul.f32 %v46_v12, %v39_v13 }
  0x7e   :  { %v49_v15 = vrot.slane %v47_v14, 1  ;;  %v52_v16 = vsub.f32 %v26_v1, %v47_v14 }
  0x80   :  { %v53_v17 = vsub.f32 %v27_v2, %v49_v15  ;;  %v54_v19 = vmul.f32 %v52_v16, %v52_v16 }
  0x82   :  { %v55_v18 = vmul.f32 %v53_v17, %v53_v17 }
  0x84   :  { %v58_v20 = vrot.slane %v55_v18, 7 }
  0x86   :  { %v59_v21 = vsel %vm33_vm0, %v58_v20, %v54_v19 }
  0x87   :  { %v61_v22 = vsel %vm36_vm1, %v59_v21, 0.0 }
  0x88   :  { %62 = vadd.xlane.f32.xlu0 %v61_v22 }
  0xfb   :  { %v63_v25 = vpop.xlane.xlu0 %62 }
  0xfc   :  { %v64_v26 = vmul.f32 %v63_v25, %v46_v12 }
  0xfe   :  { %v65_v27 = vadd.f32 1e-06, %v64_v26 }
 0x100   :  { %184 = vrsqrt.f32 %v65_v27  ;;  %vm72_vm4 = vweird.f32 %v65_v27 }
 0x106   :  { %v185_v28 = vpop.eup %184 }
 0x107   :  { %v67_v29 = vmul.f32 %v185_v28, %v65_v27  ;;  %vm73_vm3 = vweird.f32 %v185_v28 }
 0x108   :  { %vm74_vm5 = vmor %vm72_vm4, %vm73_vm3 }
 0x109   :  { %v68_v30 = vmul.f32 %v185_v28, %v67_v29 }
 0x10b   :  { %v69_v31 = vmul.f32 0.5, %v68_v30 }
 0x10d   :  { %v70_v32 = vsub.f32 1.5, %v69_v31 }
 0x10f   :  { %v71_v33 = vmul.f32 %v185_v28, %v70_v32 }
 0x111   :  { %v75_v35 = vsel %vm74_vm5, %v185_v28, %v71_v33 }
 0x112   :  { %v77_v36 = vrot.slane %v75_v35, 1  ;;  %v80_v37 = vmul.f32 %v75_v35, %v52_v16 }
 0x114   :  { %v81_v39 = vmul.f32 %v77_v36, %v53_v17  ;;  %v85_v40 = vmul.f32 %v179_v34, %v80_v37 }
 0x116   :  { %v86_v41 = vmul.f32 %v179_v34, %v81_v39  ;;  %v90_v42 = vadd.f32 %v180_v38, %v85_v40 }
 0x118   :  { %v91_v43 = vadd.f32 %v180_v38, %v86_v41  ;;  %v98_v44 = vpack.c.bf16 %v90_v42, %v90_v42 }
 0x11a   :  { %v99_v45 = vpack.c.bf16 %v91_v43, %v91_v43  ;;  %v94_v46 = vrot.slane %v91_v43, 7  ;;  %v110_v49 = vunpack.c.l.b16 %v98_v44 }
 0x11c   :  { %v111_v47 = vunpack.c.l.b16 %v99_v45  ;;  %v95_v48 = vsel %vm33_vm0, %v94_v46, %v90_v42 }
 0x11d   :  { %97 = vst.msk [vmem:[#allocation3] sm:$0x3] %vm36_vm1, %v95_v48 }
 0x11e   :  { %v112_v50 = vrot.slane %v111_v47, 7  ;;  %156 = dma.vmem_to_hbm [thread:$0]  %s152_s2, 32, %s154_s10, [#allocation4]  }
 0x120   :  { %v113_v51 = vsel %vm33_vm0, %v112_v50, %v110_v49 }
 0x121   :  { %v114_v52 = vpack.c.b16 %v113_v51, %v113_v51 }
 0x123   :  { %174 = vmatmul.msk.bf16.vlgmr.msra.gmra.mxu0 %vm127_vm6, %v114_v52 }
 0x1a0   :  { %v140_v54 = vpop.f32.mrf.mxu0 }
 0x1a1   :  { %v141_v55 = vadd.f32 %v181_v53, %v140_v54 }
 0x1a3   :  { %145 = vst.msk [vmem:[%s289_s6] sm:$0x3] %vm144_vm7, %v141_v55 }
 0x1a8   :  { %v142_v56 = vpop.f32.mrf.mxu0 }
 0x1a9   :  { %210 = dma.done.wait [#allocation4], 32  }
 0x1aa   :  { %211 = vsyncadd [#allocation4], 4294967264 }
 0x1ab   :  { %165 = vsyncpa [#allocation4], 1 }

// kernel: dinov2_forward.5
= control target key start
LH: loop header
LB: loop body
LE: loop exit
PB: predicated region body
PF: predicated region fallthrough
CT: control target
= control target key end

     0   :  { %s1196_s18 = smov 0   ;;  %s1325_s0 = inlined_call_operand.vmem [shape: f32[2,5,32], index: 0, kind: input, shape index: {}]   ;;  %s1326_s1 = inlined_call_operand.vmem [shape: f32[1,32], index: 1, kind: input, shape index: {}]   ;;  %s1327_s2 = inlined_call_operand.vmem [shape: f32[1,32], index: 2, kind: input, shape index: {}]   ;;  %s1328_s3 = inlined_call_operand.vmem [shape: bf16[32,96], index: 3, kind: input, shape index: {}]   ;;  %s1329_s4 = inlined_call_operand.vmem [shape: f32[1,96], index: 4, kind: input, shape index: {}]   ;;  %s1330_s5 = inlined_call_operand.vmem [shape: bf16[32,32], index: 5, kind: input, shape index: {}]   ;;  %s1331_s6 = inlined_call_operand.vmem [shape: f32[1,32], index: 6, kind: input, shape index: {}]   ;;  %s1332_s7 = inlined_call_operand.vmem [shape: f32[1,32], index: 7, kind: input, shape index: {}]   ;;  %s1333_s8 = inlined_call_operand.vmem [shape: f32[1,32], index: 8, kind: input, shape index: {}]   ;;  %s1334_s9 = inlined_call_operand.vmem [shape: f32[1,32], index: 9, kind: input, shape index: {}]   ;;  %s1335_s10 = inlined_call_operand.vmem [shape: bf16[32,128], index: 10, kind: input, shape index: {}]   ;;  %s1336_s11 = inlined_call_operand.vmem [shape: f32[1,128], index: 11, kind: input, shape index: {}]   ;;  %s1337_s12 = inlined_call_operand.vmem [shape: bf16[128,32], index: 12, kind: input, shape index: {}]   ;;  %s1338_s13 = inlined_call_operand.vmem [shape: f32[1,32], index: 13, kind: input, shape index: {}]   ;;  %s1339_s14 = inlined_call_operand.vmem [shape: f32[1,32], index: 14, kind: input, shape index: {}]   ;;  %s1340_s15 = inlined_call_operand.vmem [shape: f32[2,5,32], index: 15, kind: output, shape index: {}]  }
   0x1 LB: > { %s973_s19 = sadd.s32 4294967295, %s1107_s18   ;;  %p977_p0 = scmp.ge.s32.totalorder %s1107_s18, 1  ;;  %s1107_s18 = sphi %s1196_s18, %s25_s18  }
   0x2   : > { %p436_p1 = scmp.lt.s32.totalorder %s1107_s18, 3 }
   0x4   : > { %p437_p2 = pnand %p977_p0, %p436_p1 }
   0x5   : > { %p482_p3 = scmp.lt.s32.totalorder (!%p437_p2), %s973_s19, 1  ;;  %s1110_s22 = smov (!%p437_p2), 96  }
   0x6   : > { %440 = sbr.rel (%p437_p2) target bundleno = 1761 (0x6e1), region = 80  ;;  %s1112_s24 = smov (!%p437_p2), 112  }
   0x7   : > { %s1113_s25 = smov (!%p437_p2), 64   ;;  %s1114_s26 = smov (!%p437_p2), 48  }
   0xb   : > { %s1342_s19 = smov (!%p482_p3, %s973_s19), 1  ;;  %vm494_vm0 = vcmask 258048   ;;  %v1109_v2 = vmov 32.0   ;;  %v1047_v14 = vld [vmem:[%s1328_s3 + $0x8] sm:$0xff]  ;;  %v1046_v15 = vld [vmem:[%s1328_s3] sm:$0xff]  ;;  %vm553_vm5 = vcmask 261120  }
   0xc   : > { %s978_s20 = sshll.u32 %s1342_s19, 3  ;;  %1085 = vrcp.f32 %v1109_v2  ;;  %563 = vmatpush.bf16.msra.mxu0 %v1047_v14  ;;  %v1075_v25 = vld [vmem:[%s1326_s1] ss:$0 sm:$0xff]  ;;  %vm576_vm6 = vcmask 130048   ;;  %vm596_vm7 = vcmask 36864   ;;  %vm615_vm8 = vcmask 1041408  }
   0xd   : > { %s485_s23 = scalar_lea.vmem %s1325_s0, %s978_s20  ;;  %v1076_v28 = vld [vmem:[%s1327_s2] ss:$0 sm:$0xff]  ;;  %vm616_vm9 = vcmask 1042432   ;;  %v1115_v58 = vmov 65535   ;;  %vm611_vm10 = vcmask 39936   ;;  %v1049_v14 = vld [vmem:[%s1330_s5 + $0x8] sm:$0xff]  ;;  %s489_s16 = scalar_lea.vmem %s1340_s15, %s978_s20 }
   0xe   : > { %v1212_v0 = vld [vmem:[%s485_s23] sm:$0x1f]  ;;  %s1111_s23 = smov 80   ;;  %v617_v59 = vsel %vm615_vm8, 4294967295, %v1115_v58  ;;  %v1054_v58 = vld [vmem:[%s1337_s12 + $0x10] sm:$0xff] }
   0xf   : > { %v495_v1 = vsel %vm494_vm0, %v1212_v0, 0.0  ;;  %v1077_v32 = vld [vmem:[%s1329_s4] ss:$0 sm:$0xff]  ;;  %v618_v60 = vsel %vm616_vm9, %v617_v59, 0  ;;  %v1053_v59 = vld [vmem:[%s1337_s12 + $0x8] sm:$0xff] }
  0x10   : > { %496 = vadd.xlane.f32.xlu0 %v495_v1  ;;  %564 = vmatpush.bf16.msra.mxu0 %v1046_v15 }
  0x12   : > { %v1086_v3 = vpop.eup %1085 }
  0x13   : > { %v499_v4 = vmul.f32 32.0, %v1086_v3  ;;  %vm503_vm1 = vweird.f32 %v1086_v3 }
  0x15   : > { %v500_v5 = vsub.f32 1.0, %v499_v4 }
  0x17   : > { %v501_v6 = vmul.f32 %v1086_v3, %v500_v5 }
  0x19   : > { %v502_v7 = vadd.f32 %v1086_v3, %v501_v6 }
  0x1b   : > { %v1216_v8 = vsel %vm503_vm1, %v1086_v3, %v502_v7 }
  0x83   : > { %v497_v9 = vpop.xlane.xlu0 %496 }
  0x84   : > { %v505_v10 = vmul.f32 %v1216_v8, %v497_v9 }
  0x86   : > { %v506_v11 = vsub.f32 %v1212_v0, %v505_v10 }
  0x88   : > { %v507_v12 = vmul.f32 %v506_v11, %v506_v11 }
  0x8a   : > { %v508_v13 = vsel %vm494_vm0, %v507_v12, 0.0 }
  0x8b   : > { %509 = vadd.xlane.f32.xlu0 %v508_v13  ;;  %v1048_v13 = vld [vmem:[%s1330_s5] sm:$0xff] }
  0xfe   : > { %v510_v16 = vpop.xlane.xlu0 %509 }
  0xff   : > { %v511_v17 = vmul.f32 %v510_v16, %v1216_v8 }
 0x101   : > { %v512_v18 = vadd.f32 1e-06, %v511_v17 }
 0x103   : > { %1087 = vrsqrt.f32 %v512_v18  ;;  %vm519_vm3 = vweird.f32 %v512_v18 }
 0x109   : > { %v1088_v19 = vpop.eup %1087 }
 0x10a   : > { %v514_v20 = vmul.f32 %v1088_v19, %v512_v18  ;;  %vm520_vm2 = vweird.f32 %v1088_v19 }
 0x10b   : > { %vm521_vm4 = vmor %vm519_vm3, %vm520_vm2 }
 0x10c   : > { %v515_v21 = vmul.f32 %v1088_v19, %v514_v20 }
 0x10e   : > { %v516_v22 = vmul.f32 0.5, %v515_v21 }
 0x110   : > { %v517_v23 = vsub.f32 1.5, %v516_v22 }
 0x112   : > { %v518_v24 = vmul.f32 %v1088_v19, %v517_v23  ;;  %v1078_v23 = vld [vmem:[%s1331_s6] ss:$0 sm:$0xff] }
 0x114   : > { %v522_v26 = vsel %vm521_vm4, %v1088_v19, %v518_v24 }
 0x115   : > { %v523_v27 = vmul.f32 %v522_v26, %v506_v11  ;;  %v1079_v26 = vld [vmem:[%s1332_s7] ss:$0 sm:$0xff] }
 0x117   : > { %v527_v29 = vmul.f32 %v1075_v25, %v523_v27 }
 0x119   : > { %v531_v30 = vadd.f32 %v1076_v28, %v527_v29 }
 0x11b   : > { %v532_v31 = vpack.c.bf16 %v531_v30, %v531_v30 }
 0x11d   : > { %988 = vmatmul.msk.bf16.vlgmr.msra.gmra.mxu0 %vm553_vm5, %v532_v31 }
 0x19a   : > { %v566_v33 = vpop.f32.mrf.mxu0 }
 0x19b   : > { %v567_v34 = vadd.f32 %v1077_v32, %v566_v33 }
 0x19d   : > { %v572_v35 = vpack.c.bf16 %v567_v34, %v567_v34  ;;  %v570_v36 = vmul.f32 0.25, %v567_v34 }
 0x19f   : > { %574 = vrot.lane.b32.xlu2 %v572_v35, %s1110_s22  ;;  %641 = vrot.lane.b32.xlu1 %v572_v35, %s1111_s23  ;;  %v571_v38 = vpack.c.bf16 %v570_v36, %v570_v36 }
 0x1a2   : > { %v568_v37 = vpop.f32.mrf.mxu0 }
 0x1a3   : > { %v1051_v37 = vld [vmem:[%s1335_s10 + $0x8] sm:$0xff] }
 0x1a7   : > { %639 = vrot.lane.b32.xlu1 %v571_v38, %s1112_s24 }
 0x1f9   : > { %v575_v39 = vpop.permute.xlu2 %574 }
 0x1fa   : > { %v581_v40 = vsel %vm576_vm6, %v575_v39, 0 }
 0x1fb   : > { %590 = vmatpush.bf16.xpose.msra.mxu1 %v581_v40 }
 0x202   : > { %989 = vmatmul.msk.bf16.vlgmr.msra.gmra.mxu1 %vm576_vm6, %v571_v38  ;;  %v1059_v38 = vld [vmem:[%s1337_s12 + $0x38] sm:$0xff] }
 0x203   : > { %736 = vmatpush.bf16.msrb.mxu1 %v1048_v13  ;;  %v1083_v13 = vld [vmem:[%s1338_s13] ss:$0 sm:$0xff] }
 0x211   : > { %v642_v41 = vpop.permute.xlu1 %641 }
 0x212   : > { %v647_v42 = vsel %vm576_vm6, %v642_v41, 0  ;;  %v1058_v41 = vld [vmem:[%s1337_s12 + $0x30] sm:$0xff] }
 0x213   : > { %656 = vmatpush.bf16.xpose.msra.mxu3 %v647_v42 }
 0x219   : > { %v640_v43 = vpop.permute.xlu1 %639 }
 0x21a   : > { %991 = vmatmul.msk.bf16.vlgmr.msra.gmra.mxu3 %vm576_vm6, %v640_v43 }
 0x21b   : > { %815 = vmatpush.bf16.msrb.mxu3 %v1051_v37 }
 0x27f   : > { %v592_v44 = vpop.f32.mrf.mxu1 }
 0x280   : > { %v597_v45 = vsel %vm596_vm7, %v592_v44, -inf }
 0x281   : > { %598 = vmax.xlane.f32.xlu0 %v597_v45 }
 0x287   : > { %v594_v46 = vpop.f32.mrf.mxu1 }
 0x29d   : > { %v658_v47 = vpop.f32.mrf.mxu3 }
 0x29e   : > { %v662_v48 = vsel %vm596_vm7, %v658_v47, -inf }
 0x29f   : > { %663 = vmax.xlane.f32.xlu2 %v662_v48 }
 0x2a5   : > { %v660_v49 = vpop.f32.mrf.mxu3 }
 0x2b7   : > { %609 = vrot.lane.b32.xlu2 %v572_v35, %s1113_s25 }
 0x2f4   : > { %v599_v50 = vpop.xlane.xlu0 %598 }
 0x2f5   : > { %v600_v51 = vsub.f32 %v592_v44, %v599_v50 }
 0x2f7   : > { %v601_v52 = vmul.f32 1.442695, %v600_v51  ;;  %v1081_v51 = vld [vmem:[%s1334_s9] ss:$0 sm:$0xff] }
 0x2f9   : > { %1089 = vpow2.f32 %v601_v52 }
 0x2ff   : > { %v1090_v53 = vpop.eup %1089 }
 0x300   : > { %v603_v54 = vsel %vm596_vm7, %v1090_v53, 0.0 }
 0x301   : > { %604 = vadd.xlane.f32.xlu0 %v603_v54 }
 0x312   : > { %v664_v55 = vpop.xlane.xlu2 %663 }
 0x313   : > { %v665_v56 = vsub.f32 %v658_v47, %v664_v55  ;;  %v1057_v55 = vld [vmem:[%s1337_s12 + $0x28] sm:$0xff] }
 0x315   : > { %v666_v57 = vmul.f32 1.442695, %v665_v56  ;;  %674 = vrot.lane.b32.xlu0 %v572_v35, %s1114_s26  ;;  %v1056_v56 = vld [vmem:[%s1337_s12 + $0x20] sm:$0xff] }
 0x317   : > { %1091 = vpow2.f32 %v666_v57  ;;  %v1055_v57 = vld [vmem:[%s1337_s12 + $0x18] sm:$0xff] }
 0x31a   : > { %v610_v61 = vpop.permute.xlu2 %609 }
 0x31b   : > { %v620_v62 = vand.u32 %v618_v60, %v610_v61  ;;  %v1082_v61 = vld [vmem:[%s1336_s11] ss:$0 sm:$0xff] }
 0x31d   : > { %v1092_v63 = vpop.eup %1091  ;;  %629 = vmatpush.bf16.msrb.mxu0 %v620_v62 }
 0x31e   : > { %v668_v1 = vsel %vm596_vm7, %v1092_v63, 0.0 }
 0x31f   : > { %669 = vadd.xlane.f32.xlu1 %v668_v1 }
 0x321   : > { %714 = vmatpush.bf16.msra.mxu0 %v1049_v14  ;;  %v1084_v14 = vld [vmem:[%s1339_s14] ss:$0 sm:$0xff] }
 0x374   : > { %v605_v2 = vpop.xlane.xlu0 %604 }
 0x375   : > { %1093 = vrcp.f32 %v605_v2 }
 0x37b   : > { %v1094_v3 = vpop.eup %1093 }
 0x37c   : > { %v607_v4 = vmul.f32 %v1094_v3, %v1090_v53 }
 0x37e   : > { %v608_v5 = vpack.c.bf16 %v607_v4, %v607_v4 }
 0x380   : > { %990 = vmatmul.msk.bf16.vlgmr.msrb.gmra.mxu0 %vm611_vm10, %v608_v5 }
 0x387   : > { %v675_v6 = vpop.permute.xlu0 %674 }
 0x388   : > { %v680_v7 = vand.u32 %v675_v6, %v618_v60  ;;  %v1052_v60 = vld [vmem:[%s1337_s12] sm:$0xff] }
 0x38a   : > { %689 = vmatpush.bf16.msra.mxu2 %v680_v7 }
 0x38e   : > { %900 = vmatpush.bf16.msrb.mxu2 %v1059_v38 }
 0x392   : > { %v670_v9 = vpop.xlane.xlu1 %669  ;;  %901 = vmatpush.bf16.msrb.mxu2 %v1058_v41 }
 0x393   : > { %1095 = vrcp.f32 %v670_v9 }
 0x396   : > { %902 = vmatpush.bf16.msrb.mxu2 %v1057_v55 }
 0x399   : > { %v1096_v10 = vpop.eup %1095 }
 0x39a   : > { %v672_v11 = vmul.f32 %v1096_v10, %v1092_v63  ;;  %903 = vmatpush.bf16.msrb.mxu2 %v1056_v56 }
 0x39c   : > { %v673_v12 = vpack.c.bf16 %v672_v11, %v672_v11 }
 0x39e   : > { %992 = vmatmul.msk.bf16.vlgmr.msra.gmra.mxu2 %vm611_vm10, %v673_v12 }
 0x39f   : > { %904 = vmatpush.bf16.msrb.mxu2 %v1055_v57 }
 0x3a3   : > { %905 = vmatpush.bf16.msrb.mxu2 %v1054_v58 }
 0x3a7   : > { %906 = vmatpush.bf16.msrb.mxu2 %v1053_v59 }
 0x3ab   : > { %907 = vmatpush.bf16.msrb.mxu2 %v1052_v60 }
 0x3fd   : > { %v631_v15 = vpop.f32.mrf.mxu0 }
 0x3fe   : > { %v635_v16 = vpack.c.bf16 %v631_v15, %v631_v15 }
 0x400   : > { %1002 = vmatmul.msk.bf16.vlgmr.msrb.gmra.mxu1 %vm576_vm6, %v635_v16 }
 0x405   : > { %v633_v17 = vpop.f32.mrf.mxu0 }
 0x421   : > { %v691_v18 = vpop.f32.mrf.mxu2 }
 0x422   : > { %v695_v19 = vpack.c.bf16 %v691_v18, %v691_v18 }
 0x424   : > { %997 = vmatmul.msk.bf16.vlgmr.msra.gmra.mxu0 %vm576_vm6, %v695_v19 }
 0x429   : > { %v693_v20 = vpop.f32.mrf.mxu2 }
 0x47d   : > { %v738_v21 = vpop.f32.mrf.mxu1 }
 0x485   : > { %v740_v22 = vpop.f32.mrf.mxu1 }
 0x4a1   : > { %v716_v24 = vpop.f32.mrf.mxu0 }
 0x4a2   : > { %v739_v25 = vadd.f32 %v738_v21, %v716_v24 }
 0x4a4   : > { %v746_v27 = vadd.f32 %v1078_v23, %v739_v25 }
 0x4a6   : > { %v751_v28 = vmul.f32 %v1079_v26, %v746_v27 }
 0x4a8   : > { %v1261_v29 = vadd.f32 %v751_v28, %v1212_v0  ;;  %v1050_v0 = vld [vmem:[%s1335_s10] sm:$0xff] }
 0x4a9   : > { %v718_v30 = vpop.f32.mrf.mxu0  ;;  %816 = vmatpush.bf16.msrb.mxu3 %v1050_v0 }
 0x4aa   : > { %v755_v31 = vsel %vm494_vm0, %v1261_v29, 0.0 }
 0x4ab   : > { %756 = vadd.xlane.f32.xlu0 %v755_v31 }
 0x51e   : > { %v757_v32 = vpop.xlane.xlu0 %756 }
 0x51f   : > { %v758_v33 = vmul.f32 %v757_v32, %v1216_v8 }
 0x521   : > { %v759_v34 = vsub.f32 %v1261_v29, %v758_v33 }
 0x523   : > { %v760_v35 = vmul.f32 %v759_v34, %v759_v34 }
 0x525   : > { %v761_v36 = vsel %vm494_vm0, %v760_v35, 0.0 }
 0x526   : > { %762 = vadd.xlane.f32.xlu1 %v761_v36 }
 0x599   : > { %v763_v39 = vpop.xlane.xlu1 %762 }
 0x59a   : > { %v764_v40 = vmul.f32 %v763_v39, %v1216_v8  ;;  %v1080_v8 = vld [vmem:[%s1333_s8] ss:$0 sm:$0xff] }
 0x59c   : > { %v765_v42 = vadd.f32 1e-06, %v764_v40 }
 0x59e   : > { %1097 = vrsqrt.f32 %v765_v42  ;;  %vm772_vm12 = vweird.f32 %v765_v42 }
 0x5a4   : > { %v1098_v43 = vpop.eup %1097 }
 0x5a5   : > { %v767_v44 = vmul.f32 %v1098_v43, %v765_v42  ;;  %vm773_vm11 = vweird.f32 %v1098_v43 }
 0x5a6   : > { %vm774_vm13 = vmor %vm772_vm12, %vm773_vm11 }
 0x5a7   : > { %v768_v45 = vmul.f32 %v1098_v43, %v767_v44 }
 0x5a9   : > { %v769_v46 = vmul.f32 0.5, %v768_v45 }
 0x5ab   : > { %v770_v47 = vsub.f32 1.5, %v769_v46 }
 0x5ad   : > { %v771_v48 = vmul.f32 %v1098_v43, %v770_v47 }
 0x5af   : > { %v775_v49 = vsel %vm774_vm13, %v1098_v43, %v771_v48 }
 0x5b0   : > { %v776_v50 = vmul.f32 %v775_v49, %v759_v34 }
 0x5b2   : > { %v780_v52 = vmul.f32 %v1080_v8, %v776_v50 }
 0x5b4   : > { %v784_v53 = vadd.f32 %v1081_v51, %v780_v52 }
 0x5b6   : > { %v785_v54 = vpack.c.bf16 %v784_v53, %v784_v53 }
 0x5b8   : > { %1011 = vmatmul.msk.bf16.vlgmr.msrb.gmra.mxu3 %vm553_vm5, %v785_v54 }
 0x63b   : > { %v818_v62 = vpop.f32.mrf.mxu3 }
 0x63c   : > { %v819_v63 = vadd.f32 %v1082_v61, %v818_v62 }
 0x63e   : > { %v823_v1 = vmul.f32 0.044715, %v819_v63  ;;  %v822_v9 = vmul.f32 0.5, %v819_v63 }
 0x640   : > { %v824_v2 = vmul.f32 %v823_v1, %v819_v63 }
 0x642   : > { %v825_v3 = vmul.f32 %v824_v2, %v819_v63 }
 0x643   : > { %v820_v4 = vpop.f32.mrf.mxu3 }
 0x644   : > { %v826_v5 = vadd.f32 %v825_v3, %v819_v63 }
 0x646   : > { %v827_v6 = vmul.f32 0.7978846, %v826_v5 }
 0x648   : > { %1099 = vtanh.f32 %v827_v6 }
 0x64e   : > { %v1100_v7 = vpop.eup %1099 }
 0x64f   : > { %v829_v10 = vadd.f32 1.0, %v1100_v7 }
 0x651   : > { %v830_v11 = vmul.f32 %v829_v10, %v822_v9 }
 0x653   : > { %v831_v12 = vpack.c.bf16 %v830_v11, %v830_v11 }
 0x655   : > { %908 = vmatmul.bf16.vlgmr.msrb.gmra.mxu2 %v831_v12 }
 0x6d8   : > { %v909_v15 = vpop.f32.mrf.mxu2 }
 0x6d9   : > { %v910_v16 = vadd.f32 %v1083_v13, %v909_v15 }
 0x6db   : > { %v917_v17 = vmul.f32 %v1084_v14, %v910_v16 }
 0x6dd   : > { %v918_v18 = vadd.f32 %v917_v17, %v1261_v29 }
 0x6df   : > { %919 = vst.msk [vmem:[%s489_s16] sm:$0x1f] %vm494_vm0, %v918_v18 }
 0x6e0   : > { %v911_v19 = vpop.f32.mrf.mxu2 }
 0x6e1 PF: > { %s25_s18 = sadd.s32 1, %s1107_s18  }
 0x6e2   : > { %p22_p4 = scmp.ge.s32.totalorder %s25_s18, 4  }
 0x6e4   :  { %24 = sbr.rel (!%p22_p4) target bundleno = 1 (0x1), region = 110 }

</bundles_post_ra>
